<compile_context>
chip_gen: v7x
topology: tpu7x:2x2x1
jax: 0.10.0
libtpu: 0.0.40
codegen_flags: <defaults>
</compile_context>

<pallas_src>
import functools

import jax
import jax.numpy as jnp
from jax.experimental import pallas as pl
from jax.experimental.pallas import tpu as pltpu


# ----------------------------------------------------------------------------
# Helpers: padding / tile selection
# ----------------------------------------------------------------------------
def _round_up(x, m):
    return ((x + m - 1) // m) * m


def _pad2d(x, rows, cols):
    r, c = x.shape
    if r == rows and c == cols:
        return x
    return jnp.pad(x, ((0, rows - r), (0, cols - c)))


def _pick_tile(dim_pad, cap=1024):
    """Largest tile in {1024,512,256,128} (<= cap) dividing the 128-aligned dim."""
    for t in (1024, 512, 256, 128):
        if t <= cap and t <= dim_pad and dim_pad % t == 0:
            return t
    return dim_pad


# ----------------------------------------------------------------------------
# Pallas kernels
# ----------------------------------------------------------------------------
def _matmul_kernel(*refs, apply_relu, has_bias, has_wnext, b_full_k, tk):
    """out = [relu](a @ b [+ bias]) [@ w_next]; K-reduction into f32 VMEM scratch."""
    it = iter(refs)
    a_ref = next(it)
    b_ref = next(it)
    bias_ref = next(it) if has_bias else None
    wnext_ref = next(it) if has_wnext else None
    o_ref = next(it)
    acc_ref = next(it)

    kk = pl.program_id(2)

    @pl.when(kk == 0)
    def _():
        acc_ref[...] = jnp.zeros_like(acc_ref)

    if b_full_k:
        # B is held fully resident in VMEM; slice the current K-chunk in-kernel.
        start = pl.multiple_of(kk * tk, tk)
        b_blk = b_ref[pl.ds(start, tk), :]
    else:
        b_blk = b_ref[...]

    acc_ref[...] += jnp.dot(a_ref[...], b_blk, preferred_element_type=jnp.float32)

    @pl.when(kk == pl.num_programs(2) - 1)
    def _():
        out = acc_ref[...]
        if has_bias:
            out = out + bias_ref[...]
        if apply_relu:
            out = jnp.maximum(out, 0.0)
        if has_wnext:
            # Fused next-layer feature transform: (tm, tn) @ (tn, d_next_pad).
            out = jnp.dot(out.astype(wnext_ref.dtype), wnext_ref[...],
                          preferred_element_type=jnp.float32)
        o_ref[...] = out.astype(o_ref.dtype)


_RESIDENT_B_BYTES = 6 * 1024 * 1024  # per pipeline buffer


def pallas_matmul(a, b, bias=None, w_next=None, *, apply_relu=False,
                  out_dtype=jnp.float32):
    """Tiled MXU matmul on 128-aligned (padded) operands.

    out = [relu](a @ b [+ bias]) [@ w_next]
    """
    m, k = a.shape
    k2, n = b.shape
    assert k == k2, (a.shape, b.shape)
    has_bias = bias is not None
    has_wnext = w_next is not None

    # Keep >= 2 row tiles when possible so the i axis can shard across the two
    # TensorCores on v7x; otherwise grow tiles to amortize per-step overhead.
    tm = _pick_tile(m, cap=min(1024, m // 2 if m >= 256 else m))
    tk = _pick_tile(k, cap=1024)
    if has_wnext:
        # Epilogue fusion contracts over the full output width of a @ b.
        assert n <= 512, "epilogue fusion expects a narrow hidden width"
        assert w_next.shape[0] == n, (w_next.shape, n)
        tn = n
        n_out = w_next.shape[1]
    else:
        tn = _pick_tile(n, cap=512)
        n_out = n

    grid = (m // tm, n // tn, k // tk)

    # Keep the (small) B operand fully VMEM-resident when the output fits one
    # column tile: avoids re-streaming B from HBM for every row tile.
    b_resident = (tn == n) and (k * tn * b.dtype.itemsize <= _RESIDENT_B_BYTES)
    b_full_k = b_resident and grid[2] > 1

    kernel = functools.partial(
        _matmul_kernel, apply_relu=apply_relu, has_bias=has_bias,
        has_wnext=has_wnext, b_full_k=b_full_k, tk=tk)

    in_specs = [pl.BlockSpec((tm, tk), lambda i, j, kk: (i, kk))]
    if b_resident:
        in_specs.append(pl.BlockSpec((k, tn), lambda i, j, kk: (0, j)))
    else:
        in_specs.append(pl.BlockSpec((tk, tn), lambda i, j, kk: (kk, j)))
    inputs = [a, b]
    if has_bias:
        in_specs.append(pl.BlockSpec((1, tn), lambda i, j, kk: (0, j)))
        inputs.append(bias)
    if has_wnext:
        in_specs.append(pl.BlockSpec((tn, n_out), lambda i, j, kk: (0, 0)))
        inputs.append(w_next)

    if has_wnext:
        out_spec = pl.BlockSpec((tm, n_out), lambda i, j, kk: (i, 0))
    else:
        out_spec = pl.BlockSpec((tm, tn), lambda i, j, kk: (i, j))

    flops = 2 * m * n * k + (2 * m * n * n_out if has_wnext else 0)
    bytes_accessed = (
        a.size * a.dtype.itemsize
        + (b.size if b_resident else grid[0] * b.size) * b.dtype.itemsize
        + (bias.size * bias.dtype.itemsize if has_bias else 0)
        + (w_next.size * w_next.dtype.itemsize if has_wnext else 0)
        + m * n_out * jnp.dtype(out_dtype).itemsize)

    return pl.pallas_call(
        kernel,
        out_shape=jax.ShapeDtypeStruct((m, n_out), out_dtype),
        grid_spec=pltpu.PrefetchScalarGridSpec(
            num_scalar_prefetch=0,
            grid=grid,
            in_specs=in_specs,
            out_specs=out_spec,
            scratch_shapes=[pltpu.VMEM((tm, tn), jnp.float32)],
        ),
        compiler_params=pltpu.CompilerParams(
            dimension_semantics=("parallel", "parallel", "arbitrary"),
            vmem_limit_bytes=32 * 1024 * 1024,
        ),
        cost_estimate=pl.CostEstimate(
            flops=flops, transcendentals=0, bytes_accessed=bytes_accessed),
    )(*inputs)


def _embed_kernel(za_ref, zb_ref, o_ref):
    # Inputs are [D_pad, tq]: reduce over sublanes, store lane-dense [1, tq].
    dots = jnp.sum(za_ref[...] * zb_ref[...], axis=0, keepdims=True)
    o_ref[...] = 1.0 - jax.nn.sigmoid(dots)


def embed_scores(za, zb):
    """za, zb: [Q, D] f32 -> [Q]  scores = 1 - sigmoid(rowwise dot)."""
    q, d = za.shape
    q_pad = _round_up(q, 128)
    d_pad = _round_up(d, 8)
    # Queries onto the lane axis -> full-vreg (unmasked) stores.
    zat = _pad2d(za.T, d_pad, q_pad)
    zbt = _pad2d(zb.T, d_pad, q_pad)
    tq = _pick_tile(q_pad, cap=512)

    out = pl.pallas_call(
        _embed_kernel,
        out_shape=jax.ShapeDtypeStruct((1, q_pad), jnp.float32),
        grid_spec=pltpu.PrefetchScalarGridSpec(
            num_scalar_prefetch=0,
            grid=(q_pad // tq,),
            in_specs=[
                pl.BlockSpec((d_pad, tq), lambda i: (0, i)),
                pl.BlockSpec((d_pad, tq), lambda i: (0, i)),
            ],
            out_specs=pl.BlockSpec((1, tq), lambda i: (0, i)),
        ),
        compiler_params=pltpu.CompilerParams(
            dimension_semantics=("parallel",),
        ),
        cost_estimate=pl.CostEstimate(
            flops=2 * q_pad * d_pad,
            transcendentals=q_pad,
            bytes_accessed=2 * q_pad * d_pad * 4 + q_pad * 4,
        ),
    )(zat, zbt)
    return out[0, :q]


# ----------------------------------------------------------------------------
# Plain-JAX glue: graph normalization + parameter setup
# ----------------------------------------------------------------------------
def normalized_adjacency(ei, n_nodes):
    """Dense GCN-normalized adjacency  D^{-1/2} (A + I) D^{-1/2}  (float32)."""
    a = jnp.zeros((n_nodes, n_nodes), jnp.float32)
    # message flow src -> dst; symmetrize (undirected graph convention)
    a = a.at[ei[1], ei[0]].set(1.0)
    a = a.at[ei[0], ei[1]].set(1.0)
    diag = jnp.arange(n_nodes)
    a = a.at[diag, diag].set(1.0)  # self loops
    deg = a.sum(axis=1)
    d_inv_sqrt = jnp.where(deg > 0, 1.0 / jnp.sqrt(deg), 0.0)
    return d_inv_sqrt[:, None] * a * d_inv_sqrt[None, :]


class AggGAE:
    """JAX/Pallas re-implementation of the PyTorch AggGAE (GCN encoder)."""

    def __init__(self, in_dim, hidden, layers, out_dim, *, key):
        dims = [in_dim] + [hidden] * (layers - 1) + [out_dim]
        self.dims = dims
        self.layers = layers
        self.weights_pad = []   # [d_in_pad, d_out_pad] f32, zero-padded
        self.biases_pad = []    # [1, d_out_pad] f32
        self.pad_dims = []
        for i in range(layers):
            key, sub = jax.random.split(key)
            d_in, d_out = dims[i], dims[i + 1]
            d_in_pad, d_out_pad = _round_up(d_in, 128), _round_up(d_out, 128)
            scale = jnp.sqrt(6.0 / (d_in + d_out))  # Glorot-uniform
            w = jax.random.uniform(
                sub, (d_in, d_out), jnp.float32, minval=-scale, maxval=scale)
            self.weights_pad.append(_pad2d(w, d_in_pad, d_out_pad))
            self.biases_pad.append(jnp.zeros((1, d_out_pad), jnp.float32))
            self.pad_dims.append((d_in_pad, d_out_pad))
        # The whole forward (adjacency build, pads, casts, pallas_calls) is
        # compiled under one dispatch; the identity shortcut is a STATIC flag.
        self._forward_jit = jax.jit(
            self._forward_impl, static_argnames=("features_are_identity",))

    def forward(self, x, ei, *, features_are_identity=False):
        return self._forward_jit(x, ei,
                                 features_are_identity=features_are_identity)

    def _forward_impl(self, x, ei, *, features_are_identity):
        n = x.shape[0]
        n_pad = _round_up(n, 128)

        a_hat = normalized_adjacency(ei, n)
        a_bf = _pad2d(a_hat, n_pad, n_pad).astype(jnp.bfloat16)

        if features_are_identity:
            # x == eye(N): H @ W0 == W0, skip the first feature-transform matmul.
            assert self.pad_dims[0][0] == n_pad, "identity features need in_dim == N"
            hw = self.weights_pad[0].astype(jnp.bfloat16)
        else:
            h0 = _pad2d(x.astype(jnp.bfloat16), n_pad, self.pad_dims[0][0])
            hw = pallas_matmul(h0, self.weights_pad[0].astype(jnp.bfloat16),
                               out_dtype=jnp.bfloat16)

        h = None
        for l in range(self.layers):
            is_last = l == self.layers - 1
            w_next_arr = None
            fuse = False
            if not is_last:
                w_next_arr = self.weights_pad[l + 1].astype(jnp.bfloat16)
                fuse = self.pad_dims[l][1] <= 512  # fuse H@W_next into epilogue
            out = pallas_matmul(
                a_bf, hw,
                bias=self.biases_pad[l],
                w_next=w_next_arr if fuse else None,
                apply_relu=not is_last,            # no activation on output layer
                out_dtype=jnp.float32 if is_last else jnp.bfloat16,
            )
            if is_last:
                h = out
            elif fuse:
                hw = out                           # already next layer's H @ W
            else:
                hw = pallas_matmul(out, w_next_arr, out_dtype=jnp.bfloat16)
        return h[:n, : self.dims[-1]]

    def embed(self, z, ei, query):
        # 1 - sigmoid((z[q0] * z[q1]).sum(dim=1)); gather is XLA glue (Q small).
        del ei
        za = z[query[0]]
        zb = z[query[1]]
        return embed_scores(za, zb)


# ----------------------------------------------------------------------------
if __name__ == "__main__":
    key = jax.random.PRNGKey(0)
    n_nodes = 16
    in_dim = n_nodes          # x = eye(N): one-hot node features, as in the reference
    hidden = 32
    layers = 2
    out_dim = 8
    n_edges = 24
    n_query = 8

    k_edges, k_params, k_query = jax.random.split(key, 3)
    ei = jax.random.randint(k_edges, (2, n_edges), 0, n_nodes, dtype=jnp.int32)
    x = jnp.eye(n_nodes, dtype=jnp.float32)

    model = AggGAE(in_dim, hidden, layers, out_dim, key=k_params)

    z = jax.block_until_ready(model.forward(x, ei, features_are_identity=True))
    assert z.shape == (n_nodes, out_dim), z.shape

    query = jax.random.randint(k_query, (2, n_query), 0, n_nodes, dtype=jnp.int32)
    scores = jax.block_until_ready(model.embed(z, ei, query))
    assert scores.shape == (n_query,), scores.shape
    assert bool(jnp.all(jnp.isfinite(z))) and bool(jnp.all(jnp.isfinite(scores)))

    # Plain-JAX f32 reference (bf16 streaming inside the kernel -> loose tol).
    a_ref = normalized_adjacency(ei, n_nodes)
    h_ref = x
    for l in range(layers):
        w = model.weights_pad[l][: model.dims[l], : model.dims[l + 1]]
        b = model.biases_pad[l][:, : model.dims[l + 1]]
        h_ref = a_ref @ (h_ref @ w) + b
        if l < layers - 1:
            h_ref = jnp.maximum(h_ref, 0.0)
    assert jnp.allclose(z, h_ref, atol=3e-2, rtol=3e-2), float(
        jnp.max(jnp.abs(z - h_ref)))
    s_ref = 1.0 - jax.nn.sigmoid(jnp.sum(z[query[0]] * z[query[1]], axis=1))
    assert jnp.allclose(scores, s_ref, atol=1e-5), float(
        jnp.max(jnp.abs(scores - s_ref)))

    print("KERNEL_OK")
</pallas_src>

<mosaic_0001>
module attributes {stable_mosaic.version = 11 : i64} {
  func.func @_matmul_kernel(%arg0: i32, %arg1: i32, %arg2: i32, %arg3: memref<128x128xbf16, #tpu.memory_space<vmem>>, %arg4: memref<128x128xbf16, #tpu.memory_space<vmem>>, %arg5: memref<1x128xf32, #tpu.memory_space<vmem>>, %arg6: memref<128x128xf32, #tpu.memory_space<vmem>>, %arg7: memref<128x128xf32, #tpu.memory_space<vmem>>) attributes {dimension_semantics = [#tpu.dimension_semantics<parallel>, #tpu.dimension_semantics<parallel>, #tpu.dimension_semantics<arbitrary>], iteration_bounds = array<i64: 1, 1, 1>, scalar_prefetch = 0 : i64, scratch_operands = 1 : i64, tpu.core_type = #tpu.core_type<tc>, window_params = [{transform_indices = @transform_0, window_bounds = array<i64: 128, 128>}, {transform_indices = @transform_1, window_bounds = array<i64: 128, 128>}, {transform_indices = @transform_2, window_bounds = array<i64: 1, 128>}, {transform_indices = @transform_3, window_bounds = array<i64: 128, 128>}]} {
    %c0_i32 = arith.constant 0 : i32
    %0 = arith.cmpi eq, %arg2, %c0_i32 : i32
    %1 = arith.extui %0 : i1 to i32
    %c0_i32_0 = arith.constant 0 : i32
    %2 = arith.cmpi ne, %1, %c0_i32_0 : i32
    scf.if %2 {
      %cst_10 = arith.constant 0.000000e+00 : f32
      %12 = vector.broadcast %cst_10 : f32 to vector<128x128xf32>
      %c0_11 = arith.constant 0 : index
      %c0_12 = arith.constant 0 : index
      %13 = vector.load %arg7[%c0_11, %c0_12] : memref<128x128xf32, #tpu.memory_space<vmem>>, vector<128x128xf32>
      tpu.vector_store %arg7[%c0_11, %c0_12], %12 {strides = array<i32>} : memref<128x128xf32, #tpu.memory_space<vmem>>, vector<128x128xf32>,
    } else {
    }
    %c0 = arith.constant 0 : index
    %c0_1 = arith.constant 0 : index
    %3 = vector.load %arg4[%c0, %c0_1] : memref<128x128xbf16, #tpu.memory_space<vmem>>, vector<128x128xbf16>
    %c0_2 = arith.constant 0 : index
    %c0_3 = arith.constant 0 : index
    %4 = vector.load %arg7[%c0_2, %c0_3] : memref<128x128xf32, #tpu.memory_space<vmem>>, vector<128x128xf32>
    %c0_4 = arith.constant 0 : index
    %c0_5 = arith.constant 0 : index
    %5 = vector.load %arg3[%c0_4, %c0_5] : memref<128x128xbf16, #tpu.memory_space<vmem>>, vector<128x128xbf16>
    %cst = arith.constant dense<0.000000e+00> : vector<128x128xf32>
    %6 = tpu.matmul %5, %3, %cst {dimension_numbers = #tpu.dot_dimension_numbers<[1], [0], [0], [1], [0, 0, 1, 1], [], []>} : vector<128x128xbf16>, vector<128x128xbf16>, vector<128x128xf32> -> vector<128x128xf32>
    %7 = arith.addf %4, %6 : vector<128x128xf32>
    %c0_6 = arith.constant 0 : index
    %c0_7 = arith.constant 0 : index
    %8 = vector.load %arg7[%c0_6, %c0_7] : memref<128x128xf32, #tpu.memory_space<vmem>>, vector<128x128xf32>
    tpu.vector_store %arg7[%c0_6, %c0_7], %7 {strides = array<i32>} : memref<128x128xf32, #tpu.memory_space<vmem>>, vector<128x128xf32>,
    %c0_i32_8 = arith.constant 0 : i32
    %9 = arith.cmpi eq, %arg2, %c0_i32_8 : i32
    %10 = arith.extui %9 : i1 to i32
    %c0_i32_9 = arith.constant 0 : i32
    %11 = arith.cmpi ne, %10, %c0_i32_9 : i32
    scf.if %11 {
      %c0_10 = arith.constant 0 : index
      %c0_11 = arith.constant 0 : index
      %12 = vector.load %arg7[%c0_10, %c0_11] : memref<128x128xf32, #tpu.memory_space<vmem>>, vector<128x128xf32>
      %c0_12 = arith.constant 0 : index
      %c0_13 = arith.constant 0 : index
      %13 = vector.load %arg5[%c0_12, %c0_13] : memref<1x128xf32, #tpu.memory_space<vmem>>, vector<1x128xf32>
      %14 = vector.broadcast %13 : vector<1x128xf32> to vector<128x128xf32>
      %15 = arith.addf %12, %14 : vector<128x128xf32>
      %c0_14 = arith.constant 0 : index
      %c0_15 = arith.constant 0 : index
      %16 = vector.load %arg6[%c0_14, %c0_15] : memref<128x128xf32, #tpu.memory_space<vmem>>, vector<128x128xf32>
      tpu.vector_store %arg6[%c0_14, %c0_15], %15 {strides = array<i32>} : memref<128x128xf32, #tpu.memory_space<vmem>>, vector<128x128xf32>,
    } else {
    }
    return
  }
  func.func @transform_0(%arg0: i32, %arg1: i32, %arg2: i32) -> (i32, i32) {
    %c0_i32 = arith.constant 0 : i32
    return %arg0, %arg2 : i32, i32
  }
  func.func @transform_1(%arg0: i32, %arg1: i32, %arg2: i32) -> (i32, i32) {
    %c0_i32 = arith.constant 0 : i32
    %c0_i32_0 = arith.constant 0 : i32
    return %c0_i32, %arg1 : i32, i32
  }
  func.func @transform_2(%arg0: i32, %arg1: i32, %arg2: i32) -> (i32, i32) {
    %c0_i32 = arith.constant 0 : i32
    %c0_i32_0 = arith.constant 0 : i32
    return %c0_i32, %arg1 : i32, i32
  }
  func.func @transform_3(%arg0: i32, %arg1: i32, %arg2: i32) -> (i32, i32) {
    %c0_i32 = arith.constant 0 : i32
    return %arg0, %arg1 : i32, i32
  }
}

module attributes {stable_mosaic.version = 11 : i64} {
  func.func @_matmul_kernel(%arg0: i32, %arg1: i32, %arg2: i32, %arg3: memref<128x128xbf16, #tpu.memory_space<vmem>>, %arg4: memref<128x128xbf16, #tpu.memory_space<vmem>>, %arg5: memref<1x128xf32, #tpu.memory_space<vmem>>, %arg6: memref<128x128xbf16, #tpu.memory_space<vmem>>, %arg7: memref<128x128xbf16, #tpu.memory_space<vmem>>, %arg8: memref<128x128xf32, #tpu.memory_space<vmem>>) attributes {dimension_semantics = [#tpu.dimension_semantics<parallel>, #tpu.dimension_semantics<parallel>, #tpu.dimension_semantics<arbitrary>], iteration_bounds = array<i64: 1, 1, 1>, scalar_prefetch = 0 : i64, scratch_operands = 1 : i64, tpu.core_type = #tpu.core_type<tc>, window_params = [{transform_indices = @transform_0, window_bounds = array<i64: 128, 128>}, {transform_indices = @transform_1, window_bounds = array<i64: 128, 128>}, {transform_indices = @transform_2, window_bounds = array<i64: 1, 128>}, {pipeline_mode = #tpu.pipeline_mode<synchronous>, transform_indices = @transform_3, window_bounds = array<i64: 128, 128>}, {transform_indices = @transform_4, window_bounds = array<i64: 128, 128>}]} {
    %c0_i32 = arith.constant 0 : i32
    %0 = arith.cmpi eq, %arg2, %c0_i32 : i32
    %1 = arith.extui %0 : i1 to i32
    %c0_i32_0 = arith.constant 0 : i32
    %2 = arith.cmpi ne, %1, %c0_i32_0 : i32
    scf.if %2 {
      %cst_10 = arith.constant 0.000000e+00 : f32
      %12 = vector.broadcast %cst_10 : f32 to vector<128x128xf32>
      %c0_11 = arith.constant 0 : index
      %c0_12 = arith.constant 0 : index
      %13 = vector.load %arg8[%c0_11, %c0_12] : memref<128x128xf32, #tpu.memory_space<vmem>>, vector<128x128xf32>
      tpu.vector_store %arg8[%c0_11, %c0_12], %12 {strides = array<i32>} : memref<128x128xf32, #tpu.memory_space<vmem>>, vector<128x128xf32>,
    } else {
    }
    %c0 = arith.constant 0 : index
    %c0_1 = arith.constant 0 : index
    %3 = vector.load %arg4[%c0, %c0_1] : memref<128x128xbf16, #tpu.memory_space<vmem>>, vector<128x128xbf16>
    %c0_2 = arith.constant 0 : index
    %c0_3 = arith.constant 0 : index
    %4 = vector.load %arg8[%c0_2, %c0_3] : memref<128x128xf32, #tpu.memory_space<vmem>>, vector<128x128xf32>
    %c0_4 = arith.constant 0 : index
    %c0_5 = arith.constant 0 : index
    %5 = vector.load %arg3[%c0_4, %c0_5] : memref<128x128xbf16, #tpu.memory_space<vmem>>, vector<128x128xbf16>
    %cst = arith.constant dense<0.000000e+00> : vector<128x128xf32>
    %6 = tpu.matmul %5, %3, %cst {dimension_numbers = #tpu.dot_dimension_numbers<[1], [0], [0], [1], [0, 0, 1, 1], [], []>} : vector<128x128xbf16>, vector<128x128xbf16>, vector<128x128xf32> -> vector<128x128xf32>
    %7 = arith.addf %4, %6 : vector<128x128xf32>
    %c0_6 = arith.constant 0 : index
    %c0_7 = arith.constant 0 : index
    %8 = vector.load %arg8[%c0_6, %c0_7] : memref<128x128xf32, #tpu.memory_space<vmem>>, vector<128x128xf32>
    tpu.vector_store %arg8[%c0_6, %c0_7], %7 {strides = array<i32>} : memref<128x128xf32, #tpu.memory_space<vmem>>, vector<128x128xf32>,
    %c0_i32_8 = arith.constant 0 : i32
    %9 = arith.cmpi eq, %arg2, %c0_i32_8 : i32
    %10 = arith.extui %9 : i1 to i32
    %c0_i32_9 = arith.constant 0 : i32
    %11 = arith.cmpi ne, %10, %c0_i32_9 : i32
    scf.if %11 {
      %c0_10 = arith.constant 0 : index
      %c0_11 = arith.constant 0 : index
      %12 = vector.load %arg8[%c0_10, %c0_11] : memref<128x128xf32, #tpu.memory_space<vmem>>, vector<128x128xf32>
      %c0_12 = arith.constant 0 : index
      %c0_13 = arith.constant 0 : index
      %13 = vector.load %arg5[%c0_12, %c0_13] : memref<1x128xf32, #tpu.memory_space<vmem>>, vector<1x128xf32>
      %14 = vector.broadcast %13 : vector<1x128xf32> to vector<128x128xf32>
      %15 = arith.addf %12, %14 : vector<128x128xf32>
      %cst_14 = arith.constant 0.000000e+00 : f32
      %16 = vector.broadcast %cst_14 : f32 to vector<128x128xf32>
      %17 = arith.maximumf %15, %16 : vector<128x128xf32>
      %18 = arith.truncf %17 : vector<128x128xf32> to vector<128x128xbf16>
      %c0_15 = arith.constant 0 : index
      %c0_16 = arith.constant 0 : index
      %19 = vector.load %arg6[%c0_15, %c0_16] : memref<128x128xbf16, #tpu.memory_space<vmem>>, vector<128x128xbf16>
      %cst_17 = arith.constant dense<0.000000e+00> : vector<128x128xf32>
      %20 = tpu.matmul %18, %19, %cst_17 {dimension_numbers = #tpu.dot_dimension_numbers<[1], [0], [0], [1], [0, 0, 1, 1], [], []>} : vector<128x128xbf16>, vector<128x128xbf16>, vector<128x128xf32> -> vector<128x128xf32>
      %21 = arith.truncf %20 : vector<128x128xf32> to vector<128x128xbf16>
      %c0_18 = arith.constant 0 : index
      %c0_19 = arith.constant 0 : index
      %22 = vector.load %arg7[%c0_18, %c0_19] : memref<128x128xbf16, #tpu.memory_space<vmem>>, vector<128x128xbf16>
      tpu.vector_store %arg7[%c0_18, %c0_19], %21 {strides = array<i32>} : memref<128x128xbf16, #tpu.memory_space<vmem>>, vector<128x128xbf16>,
    } else {
    }
    return
  }
  func.func @transform_0(%arg0: i32, %arg1: i32, %arg2: i32) -> (i32, i32) {
    %c0_i32 = arith.constant 0 : i32
    return %arg0, %arg2 : i32, i32
  }
  func.func @transform_1(%arg0: i32, %arg1: i32, %arg2: i32) -> (i32, i32) {
    %c0_i32 = arith.constant 0 : i32
    %c0_i32_0 = arith.constant 0 : i32
    return %c0_i32, %arg1 : i32, i32
  }
  func.func @transform_2(%arg0: i32, %arg1: i32, %arg2: i32) -> (i32, i32) {
    %c0_i32 = arith.constant 0 : i32
    %c0_i32_0 = arith.constant 0 : i32
    return %c0_i32, %arg1 : i32, i32
  }
  func.func @transform_3(%arg0: i32, %arg1: i32, %arg2: i32) -> (i32, i32) {
    %c0_i32 = arith.constant 0 : i32
    %c0_i32_0 = arith.constant 0 : i32
    %c0_i32_1 = arith.constant 0 : i32
    return %c0_i32, %c0_i32_0 : i32, i32
  }
  func.func @transform_4(%arg0: i32, %arg1: i32, %arg2: i32) -> (i32, i32) {
    %c0_i32 = arith.constant 0 : i32
    %c0_i32_0 = arith.constant 0 : i32
    return %arg0, %c0_i32 : i32, i32
  }
}

</mosaic_0001>

<bundles_post_ra>
// kernel: _forward_impl.3
= control target key start
LH: loop header
LB: loop body
LE: loop exit
PB: predicated region body
PF: predicated region fallthrough
CT: control target
= control target key end

     0   :  { %s586_s1 = inlined_call_operand.vmem [shape: bf16[128,128], index: 1, kind: input, shape index: {}]   ;;  %s587_s0 = inlined_call_operand.vmem [shape: bf16[128,128], index: 0, kind: input, shape index: {}]   ;;  %s588_s2 = inlined_call_operand.vmem [shape: f32[1,128], index: 2, kind: input, shape index: {}]   ;;  %s589_s3 = inlined_call_operand.vmem [shape: f32[128,128], index: 3, kind: output, shape index: {}]  }
   0x1   :  { %v451_v0 = vld [vmem:[%s586_s1] sm:$0xff]   ;;  %v452_v1 = vld [vmem:[%s586_s1 + $0x8] sm:$0xff]   ;;  %v453_v2 = vld [vmem:[%s586_s1 + $0x10] sm:$0xff]  }
   0x2   :  { %403 = vmatprep.subr.bf16.mxu0 %v451_v0  ;;  %435 = vmatprep.subr.bf16.mxu1 %v451_v0  ;;  %v454_v3 = vld [vmem:[%s586_s1 + $0x18] sm:$0xff]   ;;  %v459_v4 = vld [vmem:[%s587_s0] sm:$0xff]   ;;  %v456_v7 = vld [vmem:[%s586_s1 + $0x28] sm:$0xff]  }
   0x3   :  { %404 = vmatpush3.bf16.msra.mxu0 %v451_v0  ;;  %443 = vmatpush3.bf16.msra.mxu1 %v451_v0  ;;  %v460_v5 = vld [vmem:[%s587_s0 + $0x20] sm:$0xff]   ;;  %v457_v8 = vld [vmem:[%s586_s1 + $0x30] sm:$0xff]   ;;  %v458_v9 = vld [vmem:[%s586_s1 + $0x38] sm:$0xff]  }
   0x4   :  { %405 = vmatprep.subr.bf16.mxu0 %v452_v1  ;;  %436 = vmatprep.subr.bf16.mxu1 %v452_v1  ;;  %v455_v6 = vld [vmem:[%s586_s1 + $0x20] sm:$0xff]   ;;  %v461_v10 = vld [vmem:[%s587_s0 + $0x8] sm:$0xff]   ;;  %v463_v12 = vld [vmem:[%s587_s0 + $0x10] sm:$0xff]  }
   0x5   :  { %419 = vmatprep.mubr.bf16.mxu0 %v459_v4  ;;  %427 = vmatprep.mubr.bf16.mxu1 %v460_v5  ;;  %v462_v11 = vld [vmem:[%s587_s0 + $0x28] sm:$0xff]   ;;  %v464_v13 = vld [vmem:[%s587_s0 + $0x30] sm:$0xff]   ;;  %v465_v14 = vld [vmem:[%s587_s0 + $0x18] sm:$0xff]  }
   0x6   :  { %v466_v15 = vld [vmem:[%s587_s0 + $0x38] sm:$0xff]   ;;  %v386_v16 = vld [vmem:[%s588_s2] ss:$0 sm:$0xff] }
   0x7   :  { %406 = vmatpush3.bf16.msra.mxu0 %v452_v1  ;;  %444 = vmatpush3.bf16.msra.mxu1 %v452_v1 }
   0x8   :  { %407 = vmatprep.subr.bf16.mxu0 %v453_v2  ;;  %437 = vmatprep.subr.bf16.mxu1 %v453_v2 }
   0xb   :  { %408 = vmatpush3.bf16.msra.mxu0 %v453_v2  ;;  %445 = vmatpush3.bf16.msra.mxu1 %v453_v2 }
   0xc   :  { %409 = vmatprep.subr.bf16.mxu0 %v454_v3  ;;  %438 = vmatprep.subr.bf16.mxu1 %v454_v3 }
   0xf   :  { %410 = vmatpush3.bf16.msra.mxu0 %v454_v3  ;;  %446 = vmatpush3.bf16.msra.mxu1 %v454_v3 }
  0x10   :  { %411 = vmatprep.subr.bf16.mxu0 %v455_v6  ;;  %439 = vmatprep.subr.bf16.mxu1 %v455_v6 }
  0x13   :  { %412 = vmatpush3.bf16.msra.mxu0 %v455_v6  ;;  %447 = vmatpush3.bf16.msra.mxu1 %v455_v6 }
  0x14   :  { %413 = vmatprep.subr.bf16.mxu0 %v456_v7  ;;  %440 = vmatprep.subr.bf16.mxu1 %v456_v7 }
  0x17   :  { %414 = vmatpush3.bf16.msra.mxu0 %v456_v7  ;;  %448 = vmatpush3.bf16.msra.mxu1 %v456_v7 }
  0x18   :  { %415 = vmatprep.subr.bf16.mxu0 %v457_v8  ;;  %441 = vmatprep.subr.bf16.mxu1 %v457_v8 }
  0x1b   :  { %416 = vmatpush3.bf16.msra.mxu0 %v457_v8  ;;  %449 = vmatpush3.bf16.msra.mxu1 %v457_v8 }
  0x1c   :  { %417 = vmatprep.subr.bf16.mxu0 %v458_v9  ;;  %442 = vmatprep.subr.bf16.mxu1 %v458_v9 }
  0x1f   :  { %418 = vmatpush3.bf16.msra.mxu0 %v458_v9  ;;  %450 = vmatpush3.bf16.msra.mxu1 %v458_v9 }
  0x22   :  { %420 = vmatmul.mubr.bf16.vlgmr.msra.gmra.mrb[0].mxu0 %v461_v10  ;;  %428 = vmatmul.mubr.bf16.vlgmr.msra.gmra.mrb[0].mxu1 %v462_v11 }
  0x23   :  { %423 = vmatprep.mubr.bf16.mxu0 %v463_v12  ;;  %431 = vmatprep.mubr.bf16.mxu1 %v464_v13 }
  0x2a   :  { %424 = vmatmul.mubr.bf16.gmra.mrb[4].mxu0 %v465_v14  ;;  %432 = vmatmul.mubr.bf16.gmra.mrb[4].mxu1 %v466_v15 }
  0xf5   :  { %v421_v17 = vpop.f32.mrb[0].mxu0  ;;  %v429_v18 = vpop.f32.mrb[0].mxu1 }
  0xf6   :  { %v336_v19 = vadd.f32 %v421_v17, %v386_v16  ;;  %v344_v20 = vadd.f32 %v429_v18, %v386_v16  ;;  %v213_v21 = vpop.f32.mrb[1].mxu0  ;;  %v245_v22 = vpop.f32.mrb[1].mxu1 }
  0xf7   :  { %v334_v23 = vadd.f32 %v386_v16, %v213_v21  ;;  %v342_v24 = vadd.f32 %v386_v16, %v245_v22  ;;  %v422_v25 = vpop.f32.mrb[2].mxu0  ;;  %v430_v26 = vpop.f32.mrb[2].mxu1 }
  0xf8   :  { %352 = vst [vmem:[%s589_s3 + $0x10] sm:$0xff] %v336_v19  ;;  %360 = vst [vmem:[%s589_s3 + $0x50] sm:$0xff] %v344_v20  ;;  %v337_v27 = vadd.f32 %v422_v25, %v386_v16  ;;  %v345_v28 = vadd.f32 %v430_v26, %v386_v16  ;;  %v216_v29 = vpop.f32.mrb[3].mxu0  ;;  %v248_v30 = vpop.f32.mrb[3].mxu1 }
  0xf9   :  { %350 = vst [vmem:[%s589_s3] sm:$0xff] %v334_v23  ;;  %358 = vst [vmem:[%s589_s3 + $0x40] sm:$0xff] %v342_v24  ;;  %v335_v31 = vadd.f32 %v386_v16, %v216_v29  ;;  %v343_v32 = vadd.f32 %v386_v16, %v248_v30 }
  0xfa   :  { %353 = vst [vmem:[%s589_s3 + $0x18] sm:$0xff] %v337_v27  ;;  %361 = vst [vmem:[%s589_s3 + $0x58] sm:$0xff] %v345_v28 }
  0xfb   :  { %351 = vst [vmem:[%s589_s3 + $0x8] sm:$0xff] %v335_v31  ;;  %359 = vst [vmem:[%s589_s3 + $0x48] sm:$0xff] %v343_v32 }
  0xfd   :  { %v425_v33 = vpop.f32.mrb[4].mxu0  ;;  %v433_v34 = vpop.f32.mrb[4].mxu1 }
  0xfe   :  { %v340_v35 = vadd.f32 %v425_v33, %v386_v16  ;;  %v348_v36 = vadd.f32 %v433_v34, %v386_v16  ;;  %v229_v37 = vpop.f32.mrb[5].mxu0  ;;  %v261_v38 = vpop.f32.mrb[5].mxu1 }
  0xff   :  { %v338_v39 = vadd.f32 %v386_v16, %v229_v37  ;;  %v346_v40 = vadd.f32 %v386_v16, %v261_v38  ;;  %v426_v41 = vpop.f32.mrb[6].mxu0  ;;  %v434_v42 = vpop.f32.mrb[6].mxu1 }
 0x100   :  { %356 = vst [vmem:[%s589_s3 + $0x30] sm:$0xff] %v340_v35  ;;  %364 = vst [vmem:[%s589_s3 + $0x70] sm:$0xff] %v348_v36  ;;  %v341_v43 = vadd.f32 %v426_v41, %v386_v16  ;;  %v349_v44 = vadd.f32 %v434_v42, %v386_v16  ;;  %v232_v45 = vpop.f32.mrb[7].mxu0  ;;  %v264_v46 = vpop.f32.mrb[7].mxu1 }
 0x101   :  { %354 = vst [vmem:[%s589_s3 + $0x20] sm:$0xff] %v338_v39  ;;  %362 = vst [vmem:[%s589_s3 + $0x60] sm:$0xff] %v346_v40  ;;  %v339_v47 = vadd.f32 %v386_v16, %v232_v45  ;;  %v347_v48 = vadd.f32 %v386_v16, %v264_v46 }
 0x102   :  { %357 = vst [vmem:[%s589_s3 + $0x38] sm:$0xff] %v341_v43  ;;  %365 = vst [vmem:[%s589_s3 + $0x78] sm:$0xff] %v349_v44 }
 0x103   :  { %355 = vst [vmem:[%s589_s3 + $0x28] sm:$0xff] %v339_v47  ;;  %363 = vst [vmem:[%s589_s3 + $0x68] sm:$0xff] %v347_v48 }

// kernel: _forward_impl.2
= control target key start
LH: loop header
LB: loop body
LE: loop exit
PB: predicated region body
PF: predicated region fallthrough
CT: control target
= control target key end

     0   :  { %s970_s1 = inlined_call_operand.vmem [shape: bf16[128,128], index: 1, kind: input, shape index: {}]   ;;  %s971_s0 = inlined_call_operand.vmem [shape: bf16[128,128], index: 0, kind: input, shape index: {}]   ;;  %s972_s3 = inlined_call_operand.vmem [shape: bf16[128,128], index: 3, kind: input, shape index: {}]   ;;  %s973_s2 = inlined_call_operand.vmem [shape: f32[1,128], index: 2, kind: input, shape index: {}]   ;;  %s974_s4 = inlined_call_operand.vmem [shape: bf16[128,128], index: 4, kind: output, shape index: {}]  }
   0x1   :  { %v822_v0 = vld [vmem:[%s970_s1] sm:$0xff]   ;;  %v823_v1 = vld [vmem:[%s970_s1 + $0x8] sm:$0xff]   ;;  %v824_v2 = vld [vmem:[%s970_s1 + $0x10] sm:$0xff]  }
   0x2   :  { %758 = vmatprep.subr.bf16.mxu0 %v822_v0  ;;  %v825_v3 = vld [vmem:[%s970_s1 + $0x18] sm:$0xff]   ;;  %v830_v4 = vld [vmem:[%s971_s0] sm:$0xff]   ;;  %v827_v6 = vld [vmem:[%s970_s1 + $0x28] sm:$0xff]  }
   0x3   :  { %759 = vmatpush3.bf16.msra.mxu0 %v822_v0  ;;  %774 = vmatprep.mubr.bf16.mxu0 %v830_v4  ;;  %v826_v5 = vld [vmem:[%s970_s1 + $0x20] sm:$0xff]   ;;  %v839_v8 = vld [vmem:[%s972_s3 + $0x8] sm:$0xff]   ;;  %v828_v9 = vld [vmem:[%s970_s1 + $0x30] sm:$0xff]  }
   0x4   :  { %760 = vmatprep.subr.bf16.mxu0 %v823_v1  ;;  %v838_v7 = vld [vmem:[%s972_s3] sm:$0xff]   ;;  %v840_v10 = vld [vmem:[%s972_s3 + $0x10] sm:$0xff]   ;;  %v829_v11 = vld [vmem:[%s970_s1 + $0x38] sm:$0xff]  }
   0x5   :  { %790 = vmatprep.subr.bf16.mxu1 %v838_v7  ;;  %v841_v12 = vld [vmem:[%s972_s3 + $0x18] sm:$0xff]   ;;  %v842_v13 = vld [vmem:[%s972_s3 + $0x20] sm:$0xff]   ;;  %v831_v14 = vld [vmem:[%s971_s0 + $0x8] sm:$0xff]  }
   0x6   :  { %791 = vmatpush3.bf16.msra.mxu1 %v838_v7  ;;  %v832_v15 = vld [vmem:[%s971_s0 + $0x10] sm:$0xff]   ;;  %v843_v16 = vld [vmem:[%s972_s3 + $0x28] sm:$0xff]   ;;  %v833_v17 = vld [vmem:[%s971_s0 + $0x18] sm:$0xff]  }
   0x7   :  { %761 = vmatpush3.bf16.msra.mxu0 %v823_v1  ;;  %792 = vmatprep.subr.bf16.mxu1 %v839_v8  ;;  %v834_v18 = vld [vmem:[%s971_s0 + $0x20] sm:$0xff]   ;;  %v835_v19 = vld [vmem:[%s971_s0 + $0x28] sm:$0xff]   ;;  %v836_v20 = vld [vmem:[%s971_s0 + $0x30] sm:$0xff]  }
   0x8   :  { %762 = vmatprep.subr.bf16.mxu0 %v824_v2  ;;  %v837_v21 = vld [vmem:[%s971_s0 + $0x38] sm:$0xff]   ;;  %v844_v22 = vld [vmem:[%s972_s3 + $0x30] sm:$0xff]   ;;  %v638_v24 = vld [vmem:[%s973_s2] ss:$0 sm:$0xff] }
   0x9   :  { %v845_v23 = vld [vmem:[%s972_s3 + $0x38] sm:$0xff]  }
   0xa   :  { %793 = vmatpush3.bf16.msra.mxu1 %v839_v8 }
   0xb   :  { %763 = vmatpush3.bf16.msra.mxu0 %v824_v2  ;;  %794 = vmatprep.subr.bf16.mxu1 %v840_v10 }
   0xc   :  { %764 = vmatprep.subr.bf16.mxu0 %v825_v3 }
   0xe   :  { %795 = vmatpush3.bf16.msra.mxu1 %v840_v10 }
   0xf   :  { %765 = vmatpush3.bf16.msra.mxu0 %v825_v3  ;;  %796 = vmatprep.subr.bf16.mxu1 %v841_v12 }
  0x10   :  { %766 = vmatprep.subr.bf16.mxu0 %v826_v5 }
  0x12   :  { %797 = vmatpush3.bf16.msra.mxu1 %v841_v12 }
  0x13   :  { %767 = vmatpush3.bf16.msra.mxu0 %v826_v5  ;;  %798 = vmatprep.subr.bf16.mxu1 %v842_v13 }
  0x14   :  { %768 = vmatprep.subr.bf16.mxu0 %v827_v6 }
  0x16   :  { %799 = vmatpush3.bf16.msra.mxu1 %v842_v13 }
  0x17   :  { %769 = vmatpush3.bf16.msra.mxu0 %v827_v6  ;;  %800 = vmatprep.subr.bf16.mxu1 %v843_v16 }
  0x18   :  { %770 = vmatprep.subr.bf16.mxu0 %v828_v9 }
  0x1a   :  { %801 = vmatpush3.bf16.msra.mxu1 %v843_v16 }
  0x1b   :  { %771 = vmatpush3.bf16.msra.mxu0 %v828_v9  ;;  %802 = vmatprep.subr.bf16.mxu1 %v844_v22 }
  0x1c   :  { %772 = vmatprep.subr.bf16.mxu0 %v829_v11 }
  0x1e   :  { %803 = vmatpush3.bf16.msra.mxu1 %v844_v22 }
  0x1f   :  { %773 = vmatpush3.bf16.msra.mxu0 %v829_v11  ;;  %804 = vmatprep.subr.bf16.mxu1 %v845_v23 }
  0x22   :  { %775 = vmatmul.mubr.bf16.vlgmr.msra.gmra.mrb[0].mxu0 %v831_v14  ;;  %805 = vmatpush3.bf16.msra.mxu1 %v845_v23 }
  0x23   :  { %778 = vmatprep.mubr.bf16.mxu0 %v832_v15 }
  0x2a   :  { %779 = vmatmul.mubr.bf16.gmra.mrb[4].mxu0 %v833_v17 }
  0x2b   :  { %782 = vmatprep.mubr.bf16.mxu0 %v834_v18 }
  0x32   :  { %783 = vmatmul.mubr.bf16.gmra.mrb[8].mxu0 %v835_v19 }
  0x33   :  { %786 = vmatprep.mubr.bf16.mxu0 %v836_v20 }
  0x3a   :  { %787 = vmatmul.mubr.bf16.gmra.mrb[12].mxu0 %v837_v21 }
  0xf5   :  { %v776_v25 = vpop.f32.mrb[0].mxu0 }
  0xf6   :  { %v339_v26 = vadd.f32 %v776_v25, %v638_v24  ;;  %v216_v27 = vpop.f32.mrb[1].mxu0 }
  0xf7   :  { %v337_v28 = vadd.f32 %v638_v24, %v216_v27  ;;  %v777_v29 = vpop.f32.mrb[2].mxu0 }
  0xf8   :  { %v340_v30 = vadd.f32 %v777_v29, %v638_v24  ;;  %v219_v31 = vpop.f32.mrb[3].mxu0  ;;  %v355_v33 = vmax.f32 %v339_v26, 0.0 }
  0xf9   :  { %v338_v32 = vadd.f32 %v638_v24, %v219_v31  ;;  %v353_v35 = vmax.f32 %v337_v28, 0.0 }
  0xfa   :  { %v356_v34 = vmax.f32 %v340_v30, 0.0 }
  0xfb   :  { %v354_v36 = vmax.f32 %v338_v32, 0.0 }
  0xfc   :  { %v370_v37 = vpack.c.bf16 %v356_v34, %v355_v33 }
  0xfd   :  { %v780_v38 = vpop.f32.mrb[4].mxu0  ;;  %v369_v39 = vpack.c.bf16 %v354_v36, %v353_v35 }
  0xfe   :  { %v343_v40 = vadd.f32 %v780_v38, %v638_v24  ;;  %v232_v41 = vpop.f32.mrb[5].mxu0 }
  0xff   :  { %v341_v42 = vadd.f32 %v638_v24, %v232_v41  ;;  %v781_v43 = vpop.f32.mrb[6].mxu0  ;;  %806 = vmatprep.mubr.bf16.mxu1 %v369_v39 }
 0x100   :  { %v344_v44 = vadd.f32 %v781_v43, %v638_v24  ;;  %v235_v45 = vpop.f32.mrb[7].mxu0  ;;  %807 = vmatmul.mubr.bf16.vlgmr.msra.gmra.mrb[0].mxu1 %v370_v37  ;;  %v359_v47 = vmax.f32 %v343_v40, 0.0 }
 0x101   :  { %v342_v46 = vadd.f32 %v638_v24, %v235_v45  ;;  %v357_v49 = vmax.f32 %v341_v42, 0.0 }
 0x102   :  { %v360_v48 = vmax.f32 %v344_v44, 0.0 }
 0x103   :  { %v358_v50 = vmax.f32 %v342_v46, 0.0 }
 0x104   :  { %v372_v51 = vpack.c.bf16 %v360_v48, %v359_v47 }
 0x105   :  { %v371_v52 = vpack.c.bf16 %v358_v50, %v357_v49  ;;  %v784_v53 = vpop.f32.mrb[8].mxu0 }
 0x106   :  { %v347_v54 = vadd.f32 %v784_v53, %v638_v24  ;;  %v248_v55 = vpop.f32.mrb[9].mxu0 }
 0x107   :  { %v345_v56 = vadd.f32 %v638_v24, %v248_v55  ;;  %v785_v57 = vpop.f32.mrb[10].mxu0  ;;  %810 = vmatprep.mubr.bf16.mxu1 %v371_v52 }
 0x108   :  { %v348_v58 = vadd.f32 %v785_v57, %v638_v24  ;;  %v251_v59 = vpop.f32.mrb[11].mxu0  ;;  %811 = vmatmul.mubr.bf16.gmra.mrb[4].mxu1 %v372_v51  ;;  %v363_v61 = vmax.f32 %v347_v54, 0.0 }
 0x109   :  { %v346_v60 = vadd.f32 %v638_v24, %v251_v59  ;;  %v361_v63 = vmax.f32 %v345_v56, 0.0 }
 0x10a   :  { %v364_v62 = vmax.f32 %v348_v58, 0.0 }
 0x10b   :  { %v362_v0 = vmax.f32 %v346_v60, 0.0 }
 0x10c   :  { %v374_v1 = vpack.c.bf16 %v364_v62, %v363_v61 }
 0x10d   :  { %v373_v2 = vpack.c.bf16 %v362_v0, %v361_v63  ;;  %v788_v3 = vpop.f32.mrb[12].mxu0 }
 0x10e   :  { %v351_v4 = vadd.f32 %v788_v3, %v638_v24  ;;  %v264_v5 = vpop.f32.mrb[13].mxu0 }
 0x10f   :  { %v349_v6 = vadd.f32 %v638_v24, %v264_v5  ;;  %v789_v7 = vpop.f32.mrb[14].mxu0  ;;  %814 = vmatprep.mubr.bf16.mxu1 %v373_v2 }
 0x110   :  { %v352_v8 = vadd.f32 %v789_v7, %v638_v24  ;;  %v267_v9 = vpop.f32.mrb[15].mxu0  ;;  %815 = vmatmul.mubr.bf16.gmra.mrb[8].mxu1 %v374_v1  ;;  %v367_v11 = vmax.f32 %v351_v4, 0.0 }
 0x111   :  { %v350_v10 = vadd.f32 %v638_v24, %v267_v9  ;;  %v365_v13 = vmax.f32 %v349_v6, 0.0 }
 0x112   :  { %v368_v12 = vmax.f32 %v352_v8, 0.0 }
 0x113   :  { %v366_v14 = vmax.f32 %v350_v10, 0.0 }
 0x114   :  { %v376_v15 = vpack.c.bf16 %v368_v12, %v367_v11 }
 0x115   :  { %v375_v16 = vpack.c.bf16 %v366_v14, %v365_v13 }
 0x117   :  { %818 = vmatprep.mubr.bf16.mxu1 %v375_v16 }
 0x118   :  { %819 = vmatmul.mubr.bf16.gmra.mrb[12].mxu1 %v376_v15 }
 0x1d3   :  { %v808_v17 = vpop.f32.mrb[0].mxu1 }
 0x1d4   :  { %v475_v18 = vpop.f32.mrb[1].mxu1 }
 0x1d5   :  { %v809_v19 = vpop.f32.mrb[2].mxu1 }
 0x1d6   :  { %v687_v20 = vpack.c.bf16 %v809_v19, %v808_v17  ;;  %v478_v21 = vpop.f32.mrb[3].mxu1 }
 0x1d7   :  { %v682_v22 = vpack.c.bf16 %v478_v21, %v475_v18 }
 0x1d8   :  { %719 = vst [vmem:[%s974_s4 + $0x8] sm:$0xff] %v687_v20  }
 0x1d9   :  { %683 = vst [vmem:[%s974_s4] sm:$0xff] %v682_v22  }
 0x1db   :  { %v812_v23 = vpop.f32.mrb[4].mxu1 }
 0x1dc   :  { %v491_v24 = vpop.f32.mrb[5].mxu1 }
 0x1dd   :  { %v813_v25 = vpop.f32.mrb[6].mxu1 }
 0x1de   :  { %v697_v26 = vpack.c.bf16 %v813_v25, %v812_v23  ;;  %v494_v27 = vpop.f32.mrb[7].mxu1 }
 0x1df   :  { %v692_v28 = vpack.c.bf16 %v494_v27, %v491_v24 }
 0x1e0   :  { %721 = vst [vmem:[%s974_s4 + $0x18] sm:$0xff] %v697_v26  }
 0x1e1   :  { %720 = vst [vmem:[%s974_s4 + $0x10] sm:$0xff] %v692_v28  }
 0x1e3   :  { %v816_v29 = vpop.f32.mrb[8].mxu1 }
 0x1e4   :  { %v507_v30 = vpop.f32.mrb[9].mxu1 }
 0x1e5   :  { %v817_v31 = vpop.f32.mrb[10].mxu1 }
 0x1e6   :  { %v707_v32 = vpack.c.bf16 %v817_v31, %v816_v29  ;;  %v510_v33 = vpop.f32.mrb[11].mxu1 }
 0x1e7   :  { %v702_v34 = vpack.c.bf16 %v510_v33, %v507_v30 }
 0x1e8   :  { %723 = vst [vmem:[%s974_s4 + $0x28] sm:$0xff] %v707_v32  }
 0x1e9   :  { %722 = vst [vmem:[%s974_s4 + $0x20] sm:$0xff] %v702_v34  }
 0x1eb   :  { %v820_v35 = vpop.f32.mrb[12].mxu1 }
 0x1ec   :  { %v523_v36 = vpop.f32.mrb[13].mxu1 }
 0x1ed   :  { %v821_v37 = vpop.f32.mrb[14].mxu1 }
 0x1ee   :  { %v717_v38 = vpack.c.bf16 %v821_v37, %v820_v35  ;;  %v526_v39 = vpop.f32.mrb[15].mxu1 }
 0x1ef   :  { %v712_v40 = vpack.c.bf16 %v526_v39, %v523_v36 }
 0x1f0   :  { %725 = vst [vmem:[%s974_s4 + $0x38] sm:$0xff] %v717_v38  }
 0x1f1   :  { %724 = vst [vmem:[%s974_s4 + $0x30] sm:$0xff] %v712_v40  }

</bundles_post_ra>
